<compile_context>
chip_gen: v5e
topology: v5e:2x2
jax: 0.10.0
libtpu: 0.0.40
codegen_flags: <defaults>
</compile_context>

<pallas_src>
import functools
from typing import NamedTuple, Optional

import jax
import jax.numpy as jnp
from jax.experimental import pallas as pl
from jax.experimental.pallas import tpu as pltpu


# ----------------------------------------------------------------------------
# small helpers
# ----------------------------------------------------------------------------
def _round_up(n: int, m: int) -> int:
    return ((n + m - 1) // m) * m


def _cdiv(a: int, b: int) -> int:
    return -(-a // b)


@functools.lru_cache(maxsize=None)
def _vmem_limit_bytes() -> int:
    """Generation-aware scoped-VMEM budget (~108 MiB on v5e/v6e, ~54 MiB on v7x)."""
    try:
        cap = int(pltpu.get_tpu_info().vmem_capacity_bytes)
    except Exception:
        cap = 64 * 1024 * 1024  # conservative fallback (v7x per-core VMEM)
    return min(int(cap * 0.85), 110 * 1024 * 1024)


@functools.lru_cache(maxsize=None)
def _is_pre_v6() -> bool:
    try:
        kind = jax.devices()[0].device_kind.lower()
    except Exception:
        return False
    return ("v5" in kind) or ("v4" in kind) or ("v3" in kind)


def _lane_granule(dim: int) -> int:
    """Padding granule for a feature dim: 256 on v6e/v7x for large dims
    (256-wide MXU), 128 otherwise (v5e's MXU is 128x128; small dims stay 128)."""
    if dim < 256:
        return 128
    return 128 if _is_pre_v6() else 256


class MLP2Params(NamedTuple):
    w1: jax.Array  # (K, H)  padded, bf16 (or f32)   -- PyTorch fc1.weight.T
    b1: jax.Array  # (1, H)  padded, f32
    w2: jax.Array  # (H, N)  padded, bf16 (or f32)   -- PyTorch fc2.weight.T
    b2: jax.Array  # (1, N)  padded, f32


class MLP2Meta(NamedTuple):
    out_dim: int   # original (unpadded) output width
    block_h: int   # hidden tile size; == padded hidden => weights fully resident


# ----------------------------------------------------------------------------
# kernel: fused fc1 -> bias -> leaky_relu(0.2) -> fc2 -> bias
# grid = (batch tiles, hidden tiles); hidden axis is a reduction for fc2.
# ----------------------------------------------------------------------------
def mlp2_kernel(x_ref, w1_ref, b1_ref, w2_ref, b2_ref, o_ref, acc_ref):
    h_idx = pl.program_id(1)

    @pl.when(h_idx == 0)
    def _init():
        acc_ref[...] = jnp.zeros_like(acc_ref)

    # fc1 partial: x @ W1[:, h_tile] + b1[h_tile]   (bf16 operands, f32 acc)
    h = jnp.dot(x_ref[...].astype(w1_ref.dtype), w1_ref[...],
                preferred_element_type=jnp.float32)
    h = h + b1_ref[...]
    # leaky_relu(negative_slope=0.2) — elementwise over hidden, so tiling H is exact
    h = jnp.where(h >= 0, h, 0.2 * h)
    # fc2 partial: accumulate h_tile @ W2[h_tile, :]
    acc_ref[...] += jnp.dot(h.astype(w2_ref.dtype), w2_ref[...],
                            preferred_element_type=jnp.float32)

    @pl.when(h_idx == pl.num_programs(1) - 1)
    def _finalize():
        o_ref[...] = (acc_ref[...] + b2_ref[...]).astype(o_ref.dtype)


# ----------------------------------------------------------------------------
# one-time parameter preparation (pad + cast hoisted out of the forward call)
# ----------------------------------------------------------------------------
def prepare_params(w1, b1, w2, b2, *, use_bf16: bool = True,
                   block_h: int = 512, force_h_tiling: bool = False):
    """Pad feature dims to MXU-friendly multiples and cast weights ONCE.

    w1: (input_dim, hidden), w2: (hidden, output_dim)  -- i.e. PyTorch weight.T
    b1: (hidden,) / (1, hidden), b2: (output_dim,) / (1, output_dim).
    Returns (MLP2Params, MLP2Meta)."""
    in_dim, hidden = w1.shape
    out_dim = w2.shape[1]
    b1 = jnp.reshape(b1, (1, hidden))
    b2 = jnp.reshape(b2, (1, out_dim))

    K = _round_up(in_dim, _lane_granule(in_dim))
    H = _round_up(hidden, _lane_granule(hidden))
    N = _round_up(out_dim, _lane_granule(out_dim))

    w_itemsize = 2 if use_bf16 else 4
    # Large layers: tile the hidden dim so the weights don't have to be fully
    # VMEM-resident (critical on v7x's 64 MiB VMEM).
    if force_h_tiling or w_itemsize * (K * H + H * N) > _vmem_limit_bytes() // 2:
        tH = min(_round_up(block_h, 128), H)
        H = _round_up(H, tH)
    else:
        tH = H

    w_dtype = jnp.bfloat16 if use_bf16 else jnp.float32
    w1_p = jnp.pad(w1, ((0, K - in_dim), (0, H - hidden))).astype(w_dtype)
    b1_p = jnp.pad(b1, ((0, 0), (0, H - hidden))).astype(jnp.float32)
    w2_p = jnp.pad(w2, ((0, H - hidden), (0, N - out_dim))).astype(w_dtype)
    b2_p = jnp.pad(b2, ((0, 0), (0, N - out_dim))).astype(jnp.float32)

    return MLP2Params(w1_p, b1_p, w2_p, b2_p), MLP2Meta(out_dim=out_dim, block_h=tH)


# ----------------------------------------------------------------------------
# forward
# ----------------------------------------------------------------------------
@functools.partial(
    jax.jit,
    static_argnames=("meta", "block_b", "out_dtype", "single_buffer_weights"))
def mlp_2_forward(x, params: MLP2Params, *, meta: MLP2Meta, block_b: int = 256,
                  out_dtype=None, single_buffer_weights: bool = True):
    """x: (B, input_dim) f32/bf16.  Returns (B, output_dim)."""
    B, in_dim = x.shape
    K, H = params.w1.shape
    N = params.w2.shape[1]
    tH = meta.block_h
    n_h = H // tH
    out_dtype = x.dtype if out_dtype is None else out_dtype

    # ---- batch tiling: bf16-friendly sublane multiple, >=2 tiles when possible
    # (v7x megacore), padding waste bounded (no round-up by a whole block_b) ----
    min_tb = 16 if params.w1.dtype == jnp.bfloat16 else 8
    b_aligned = _round_up(B, min_tb)
    n_b = max(1, _cdiv(b_aligned, block_b))
    if n_b == 1 and b_aligned >= 2 * min_tb:
        n_b = 2
    TB = _round_up(_cdiv(b_aligned, n_b), min_tb)
    Bp = n_b * TB

    # ---- pad x only if actually needed (no extra pass in the aligned case);
    # the bf16 cast happens inside the kernel on the (TB, K) tile ----
    if (Bp != B) or (K != in_dim):
        x_p = jnp.pad(x, ((0, Bp - B), (0, K - in_dim)))
    else:
        x_p = x

    # ---- weight BlockSpecs: single-buffer when fully resident (constant index) ----
    w_mode = pl.Buffered(1) if (single_buffer_weights and n_h == 1) else None

    def wspec(shape, index_map):
        if w_mode is not None:
            return pl.BlockSpec(shape, index_map, pipeline_mode=w_mode)
        return pl.BlockSpec(shape, index_map)

    in_specs = [
        pl.BlockSpec((TB, K), lambda i, h: (i, 0)),   # x tile (pipelined over batch)
        wspec((K, tH), lambda i, h: (0, h)),          # w1
        wspec((1, tH), lambda i, h: (0, h)),          # b1
        wspec((tH, N), lambda i, h: (h, 0)),          # w2
        wspec((1, N), lambda i, h: (0, 0)),           # b2
    ]
    out_specs = pl.BlockSpec((TB, N), lambda i, h: (i, 0))

    itemsize = lambda a: jnp.dtype(a.dtype).itemsize
    cost = pl.CostEstimate(
        flops=2 * Bp * K * H + 2 * Bp * H * N,
        transcendentals=0,
        bytes_accessed=(Bp * K * itemsize(x_p)
                        + K * H * itemsize(params.w1) + H * N * itemsize(params.w2)
                        + 4 * (H + N)
                        + Bp * N * jnp.dtype(out_dtype).itemsize),
    )

    out_p = pl.pallas_call(
        mlp2_kernel,
        out_shape=jax.ShapeDtypeStruct((Bp, N), out_dtype),
        grid_spec=pltpu.PrefetchScalarGridSpec(
            num_scalar_prefetch=0,
            grid=(Bp // TB, n_h),
            in_specs=in_specs,
            out_specs=out_specs,
            scratch_shapes=[pltpu.VMEM((TB, N), jnp.float32)],
        ),
        compiler_params=pltpu.CompilerParams(
            dimension_semantics=("parallel", "arbitrary"),
            vmem_limit_bytes=_vmem_limit_bytes(),
        ),
        cost_estimate=cost,
    )(x_p, params.w1, params.b1, params.w2, params.b2)

    # drop batch / lane padding
    return out_p[:B, :meta.out_dim]


# ----------------------------------------------------------------------------
# init mimicking nn.Linear: uniform(-1/sqrt(fan_in), 1/sqrt(fan_in))
# ----------------------------------------------------------------------------
def init_params(key, input_dim, hidden_dim, output_dim):
    k1, k2, k3, k4 = jax.random.split(key, 4)
    bound1 = 1.0 / (input_dim ** 0.5)
    bound2 = 1.0 / (hidden_dim ** 0.5)
    # stored (in, out) == PyTorch weight.T
    w1 = jax.random.uniform(k1, (input_dim, hidden_dim), jnp.float32, -bound1, bound1)
    b1 = jax.random.uniform(k2, (hidden_dim,), jnp.float32, -bound1, bound1)
    w2 = jax.random.uniform(k3, (hidden_dim, output_dim), jnp.float32, -bound2, bound2)
    b2 = jax.random.uniform(k4, (output_dim,), jnp.float32, -bound2, bound2)
    return w1, b1, w2, b2


def _ref_forward(x, w1, b1, w2, b2):
    h = x @ w1 + b1
    h = jnp.where(h >= 0, h, 0.2 * h)
    return h @ w2 + b2


if __name__ == "__main__":
    key = jax.random.PRNGKey(0)
    k_in, k_p1, k_p2 = jax.random.split(key, 3)

    # ---- case 1: small GAN-style MLP, resident-weight (single-buffer) path ----
    batch, input_dim, hidden_dim, output_dim = 8, 32, 64, 16
    x = jax.random.normal(k_in, (batch, input_dim), jnp.float32)
    w1, b1, w2, b2 = init_params(k_p1, input_dim, hidden_dim, output_dim)
    params, meta = prepare_params(w1, b1, w2, b2, use_bf16=True)

    try:
        out = jax.block_until_ready(mlp_2_forward(x, params, meta=meta))
    except Exception:
        # fallback if this JAX build rejects single-buffered resident weights
        out = jax.block_until_ready(
            mlp_2_forward(x, params, meta=meta, single_buffer_weights=False))
    assert out.shape == (batch, output_dim)
    ref = _ref_forward(x, w1, b1, w2, b2)
    assert jnp.allclose(out, ref, atol=5e-2, rtol=5e-2), "resident path mismatch"

    # ---- case 2: hidden-tiled reduction path (v7x large-layer fallback),
    #              forced at small shapes for coverage ----
    batch2, in2, hid2, out2 = 24, 48, 192, 40
    x2 = jax.random.normal(jax.random.PRNGKey(1), (batch2, in2), jnp.float32)
    w1b, b1b, w2b, b2b = init_params(k_p2, in2, hid2, out2)
    params2, meta2 = prepare_params(w1b, b1b, w2b, b2b, use_bf16=True,
                                    block_h=128, force_h_tiling=True)
    out_t = jax.block_until_ready(mlp_2_forward(x2, params2, meta=meta2))
    assert out_t.shape == (batch2, out2)
    ref2 = _ref_forward(x2, w1b, b1b, w2b, b2b)
    assert jnp.allclose(out_t, ref2, atol=5e-2, rtol=5e-2), "tiled path mismatch"

    print("KERNEL_OK")
</pallas_src>

<mosaic_0001>
module attributes {stable_mosaic.version = 11 : i64} {
  func.func @mlp2_kernel(%arg0: i32, %arg1: i32, %arg2: memref<16x128xf32, #tpu.memory_space<vmem>>, %arg3: memref<128x128xbf16, #tpu.memory_space<vmem>>, %arg4: memref<1x128xf32, #tpu.memory_space<vmem>>, %arg5: memref<128x128xbf16, #tpu.memory_space<vmem>>, %arg6: memref<1x128xf32, #tpu.memory_space<vmem>>, %arg7: memref<16x128xf32, #tpu.memory_space<vmem>>, %arg8: memref<16x128xf32, #tpu.memory_space<vmem>>) attributes {dimension_semantics = [#tpu.dimension_semantics<parallel>, #tpu.dimension_semantics<arbitrary>], iteration_bounds = array<i64: 1, 1>, scalar_prefetch = 0 : i64, scratch_operands = 1 : i64, tpu.core_type = #tpu.core_type<tc>, window_params = [{transform_indices = @transform_0, window_bounds = array<i64: 16, 128>}, {pipeline_mode = #tpu.pipeline_mode<synchronous>, transform_indices = @transform_1, window_bounds = array<i64: 128, 128>}, {pipeline_mode = #tpu.pipeline_mode<synchronous>, transform_indices = @transform_2, window_bounds = array<i64: 1, 128>}, {pipeline_mode = #tpu.pipeline_mode<synchronous>, transform_indices = @transform_3, window_bounds = array<i64: 128, 128>}, {pipeline_mode = #tpu.pipeline_mode<synchronous>, transform_indices = @transform_4, window_bounds = array<i64: 1, 128>}, {transform_indices = @transform_5, window_bounds = array<i64: 16, 128>}]} {
    %c0_i32 = arith.constant 0 : i32
    %0 = arith.cmpi eq, %arg1, %c0_i32 : i32
    %1 = arith.extui %0 : i1 to i32
    %c0_i32_0 = arith.constant 0 : i32
    %2 = arith.cmpi ne, %1, %c0_i32_0 : i32
    scf.if %2 {
      %cst_17 = arith.constant 0.000000e+00 : f32
      %24 = vector.broadcast %cst_17 : f32 to vector<16x128xf32>
      %c0_18 = arith.constant 0 : index
      %c0_19 = arith.constant 0 : index
      %25 = vector.load %arg8[%c0_18, %c0_19] : memref<16x128xf32, #tpu.memory_space<vmem>>, vector<16x128xf32>
      tpu.vector_store %arg8[%c0_18, %c0_19], %24 {strides = array<i32>} : memref<16x128xf32, #tpu.memory_space<vmem>>, vector<16x128xf32>,
    } else {
    }
    %c0 = arith.constant 0 : index
    %c0_1 = arith.constant 0 : index
    %3 = vector.load %arg2[%c0, %c0_1] : memref<16x128xf32, #tpu.memory_space<vmem>>, vector<16x128xf32>
    %4 = arith.truncf %3 : vector<16x128xf32> to vector<16x128xbf16>
    %c0_2 = arith.constant 0 : index
    %c0_3 = arith.constant 0 : index
    %5 = vector.load %arg3[%c0_2, %c0_3] : memref<128x128xbf16, #tpu.memory_space<vmem>>, vector<128x128xbf16>
    %cst = arith.constant dense<0.000000e+00> : vector<16x128xf32>
    %6 = tpu.matmul %4, %5, %cst {dimension_numbers = #tpu.dot_dimension_numbers<[1], [0], [0], [1], [0, 0, 1, 1], [], []>} : vector<16x128xbf16>, vector<128x128xbf16>, vector<16x128xf32> -> vector<16x128xf32>
    %c0_4 = arith.constant 0 : index
    %c0_5 = arith.constant 0 : index
    %7 = vector.load %arg4[%c0_4, %c0_5] : memref<1x128xf32, #tpu.memory_space<vmem>>, vector<1x128xf32>
    %8 = vector.broadcast %7 : vector<1x128xf32> to vector<16x128xf32>
    %9 = arith.addf %6, %8 : vector<16x128xf32>
    %cst_6 = arith.constant 0.000000e+00 : f32
    %10 = vector.broadcast %cst_6 : f32 to vector<16x128xf32>
    %11 = arith.cmpf oge, %9, %10 : vector<16x128xf32>
    %cst_7 = arith.constant 2.000000e-01 : f32
    %12 = vector.broadcast %cst_7 : f32 to vector<16x128xf32>
    %13 = arith.mulf %12, %9 : vector<16x128xf32>
    %14 = arith.select %11, %9, %13 : vector<16x128xi1>, vector<16x128xf32>
    %c0_8 = arith.constant 0 : index
    %c0_9 = arith.constant 0 : index
    %15 = vector.load %arg8[%c0_8, %c0_9] : memref<16x128xf32, #tpu.memory_space<vmem>>, vector<16x128xf32>
    %16 = arith.truncf %14 : vector<16x128xf32> to vector<16x128xbf16>
    %c0_10 = arith.constant 0 : index
    %c0_11 = arith.constant 0 : index
    %17 = vector.load %arg5[%c0_10, %c0_11] : memref<128x128xbf16, #tpu.memory_space<vmem>>, vector<128x128xbf16>
    %cst_12 = arith.constant dense<0.000000e+00> : vector<16x128xf32>
    %18 = tpu.matmul %16, %17, %cst_12 {dimension_numbers = #tpu.dot_dimension_numbers<[1], [0], [0], [1], [0, 0, 1, 1], [], []>} : vector<16x128xbf16>, vector<128x128xbf16>, vector<16x128xf32> -> vector<16x128xf32>
    %19 = arith.addf %15, %18 : vector<16x128xf32>
    %c0_13 = arith.constant 0 : index
    %c0_14 = arith.constant 0 : index
    %20 = vector.load %arg8[%c0_13, %c0_14] : memref<16x128xf32, #tpu.memory_space<vmem>>, vector<16x128xf32>
    tpu.vector_store %arg8[%c0_13, %c0_14], %19 {strides = array<i32>} : memref<16x128xf32, #tpu.memory_space<vmem>>, vector<16x128xf32>,
    %c0_i32_15 = arith.constant 0 : i32
    %21 = arith.cmpi eq, %arg1, %c0_i32_15 : i32
    %22 = arith.extui %21 : i1 to i32
    %c0_i32_16 = arith.constant 0 : i32
    %23 = arith.cmpi ne, %22, %c0_i32_16 : i32
    scf.if %23 {
      %c0_17 = arith.constant 0 : index
      %c0_18 = arith.constant 0 : index
      %24 = vector.load %arg8[%c0_17, %c0_18] : memref<16x128xf32, #tpu.memory_space<vmem>>, vector<16x128xf32>
      %c0_19 = arith.constant 0 : index
      %c0_20 = arith.constant 0 : index
      %25 = vector.load %arg6[%c0_19, %c0_20] : memref<1x128xf32, #tpu.memory_space<vmem>>, vector<1x128xf32>
      %26 = vector.broadcast %25 : vector<1x128xf32> to vector<16x128xf32>
      %27 = arith.addf %24, %26 : vector<16x128xf32>
      %c0_21 = arith.constant 0 : index
      %c0_22 = arith.constant 0 : index
      %28 = vector.load %arg7[%c0_21, %c0_22] : memref<16x128xf32, #tpu.memory_space<vmem>>, vector<16x128xf32>
      tpu.vector_store %arg7[%c0_21, %c0_22], %27 {strides = array<i32>} : memref<16x128xf32, #tpu.memory_space<vmem>>, vector<16x128xf32>,
    } else {
    }
    return
  }
  func.func @transform_0(%arg0: i32, %arg1: i32) -> (i32, i32) {
    %c0_i32 = arith.constant 0 : i32
    %c0_i32_0 = arith.constant 0 : i32
    return %arg0, %c0_i32 : i32, i32
  }
  func.func @transform_1(%arg0: i32, %arg1: i32) -> (i32, i32) {
    %c0_i32 = arith.constant 0 : i32
    %c0_i32_0 = arith.constant 0 : i32
    return %c0_i32, %arg1 : i32, i32
  }
  func.func @transform_2(%arg0: i32, %arg1: i32) -> (i32, i32) {
    %c0_i32 = arith.constant 0 : i32
    %c0_i32_0 = arith.constant 0 : i32
    return %c0_i32, %arg1 : i32, i32
  }
  func.func @transform_3(%arg0: i32, %arg1: i32) -> (i32, i32) {
    %c0_i32 = arith.constant 0 : i32
    %c0_i32_0 = arith.constant 0 : i32
    return %arg1, %c0_i32 : i32, i32
  }
  func.func @transform_4(%arg0: i32, %arg1: i32) -> (i32, i32) {
    %c0_i32 = arith.constant 0 : i32
    %c0_i32_0 = arith.constant 0 : i32
    %c0_i32_1 = arith.constant 0 : i32
    return %c0_i32, %c0_i32_0 : i32, i32
  }
  func.func @transform_5(%arg0: i32, %arg1: i32) -> (i32, i32) {
    %c0_i32 = arith.constant 0 : i32
    %c0_i32_0 = arith.constant 0 : i32
    return %arg0, %c0_i32 : i32, i32
  }
}

module attributes {stable_mosaic.version = 11 : i64} {
  func.func @mlp2_kernel(%arg0: i32, %arg1: i32, %arg2: memref<16x128xf32, #tpu.memory_space<vmem>>, %arg3: memref<128x128xbf16, #tpu.memory_space<vmem>>, %arg4: memref<1x128xf32, #tpu.memory_space<vmem>>, %arg5: memref<128x128xbf16, #tpu.memory_space<vmem>>, %arg6: memref<1x128xf32, #tpu.memory_space<vmem>>, %arg7: memref<16x128xf32, #tpu.memory_space<vmem>>, %arg8: memref<16x128xf32, #tpu.memory_space<vmem>>) attributes {dimension_semantics = [#tpu.dimension_semantics<parallel>, #tpu.dimension_semantics<arbitrary>], iteration_bounds = array<i64: 1, 1>, scalar_prefetch = 0 : i64, scratch_operands = 1 : i64, tpu.core_type = #tpu.core_type<tc>, window_params = [{transform_indices = @transform_0, window_bounds = array<i64: 16, 128>}, {transform_indices = @transform_1, window_bounds = array<i64: 128, 128>}, {transform_indices = @transform_2, window_bounds = array<i64: 1, 128>}, {transform_indices = @transform_3, window_bounds = array<i64: 128, 128>}, {pipeline_mode = #tpu.pipeline_mode<synchronous>, transform_indices = @transform_4, window_bounds = array<i64: 1, 128>}, {transform_indices = @transform_5, window_bounds = array<i64: 16, 128>}]} {
    %c0_i32 = arith.constant 0 : i32
    %0 = arith.cmpi eq, %arg1, %c0_i32 : i32
    %1 = arith.extui %0 : i1 to i32
    %c0_i32_0 = arith.constant 0 : i32
    %2 = arith.cmpi ne, %1, %c0_i32_0 : i32
    scf.if %2 {
      %cst_17 = arith.constant 0.000000e+00 : f32
      %24 = vector.broadcast %cst_17 : f32 to vector<16x128xf32>
      %c0_18 = arith.constant 0 : index
      %c0_19 = arith.constant 0 : index
      %25 = vector.load %arg8[%c0_18, %c0_19] : memref<16x128xf32, #tpu.memory_space<vmem>>, vector<16x128xf32>
      tpu.vector_store %arg8[%c0_18, %c0_19], %24 {strides = array<i32>} : memref<16x128xf32, #tpu.memory_space<vmem>>, vector<16x128xf32>,
    } else {
    }
    %c0 = arith.constant 0 : index
    %c0_1 = arith.constant 0 : index
    %3 = vector.load %arg2[%c0, %c0_1] : memref<16x128xf32, #tpu.memory_space<vmem>>, vector<16x128xf32>
    %4 = arith.truncf %3 : vector<16x128xf32> to vector<16x128xbf16>
    %c0_2 = arith.constant 0 : index
    %c0_3 = arith.constant 0 : index
    %5 = vector.load %arg3[%c0_2, %c0_3] : memref<128x128xbf16, #tpu.memory_space<vmem>>, vector<128x128xbf16>
    %cst = arith.constant dense<0.000000e+00> : vector<16x128xf32>
    %6 = tpu.matmul %4, %5, %cst {dimension_numbers = #tpu.dot_dimension_numbers<[1], [0], [0], [1], [0, 0, 1, 1], [], []>} : vector<16x128xbf16>, vector<128x128xbf16>, vector<16x128xf32> -> vector<16x128xf32>
    %c0_4 = arith.constant 0 : index
    %c0_5 = arith.constant 0 : index
    %7 = vector.load %arg4[%c0_4, %c0_5] : memref<1x128xf32, #tpu.memory_space<vmem>>, vector<1x128xf32>
    %8 = vector.broadcast %7 : vector<1x128xf32> to vector<16x128xf32>
    %9 = arith.addf %6, %8 : vector<16x128xf32>
    %cst_6 = arith.constant 0.000000e+00 : f32
    %10 = vector.broadcast %cst_6 : f32 to vector<16x128xf32>
    %11 = arith.cmpf oge, %9, %10 : vector<16x128xf32>
    %cst_7 = arith.constant 2.000000e-01 : f32
    %12 = vector.broadcast %cst_7 : f32 to vector<16x128xf32>
    %13 = arith.mulf %12, %9 : vector<16x128xf32>
    %14 = arith.select %11, %9, %13 : vector<16x128xi1>, vector<16x128xf32>
    %c0_8 = arith.constant 0 : index
    %c0_9 = arith.constant 0 : index
    %15 = vector.load %arg8[%c0_8, %c0_9] : memref<16x128xf32, #tpu.memory_space<vmem>>, vector<16x128xf32>
    %16 = arith.truncf %14 : vector<16x128xf32> to vector<16x128xbf16>
    %c0_10 = arith.constant 0 : index
    %c0_11 = arith.constant 0 : index
    %17 = vector.load %arg5[%c0_10, %c0_11] : memref<128x128xbf16, #tpu.memory_space<vmem>>, vector<128x128xbf16>
    %cst_12 = arith.constant dense<0.000000e+00> : vector<16x128xf32>
    %18 = tpu.matmul %16, %17, %cst_12 {dimension_numbers = #tpu.dot_dimension_numbers<[1], [0], [0], [1], [0, 0, 1, 1], [], []>} : vector<16x128xbf16>, vector<128x128xbf16>, vector<16x128xf32> -> vector<16x128xf32>
    %19 = arith.addf %15, %18 : vector<16x128xf32>
    %c0_13 = arith.constant 0 : index
    %c0_14 = arith.constant 0 : index
    %20 = vector.load %arg8[%c0_13, %c0_14] : memref<16x128xf32, #tpu.memory_space<vmem>>, vector<16x128xf32>
    tpu.vector_store %arg8[%c0_13, %c0_14], %19 {strides = array<i32>} : memref<16x128xf32, #tpu.memory_space<vmem>>, vector<16x128xf32>,
    %c0_i32_15 = arith.constant 0 : i32
    %21 = arith.cmpi eq, %arg1, %c0_i32_15 : i32
    %22 = arith.extui %21 : i1 to i32
    %c0_i32_16 = arith.constant 0 : i32
    %23 = arith.cmpi ne, %22, %c0_i32_16 : i32
    scf.if %23 {
      %c0_17 = arith.constant 0 : index
      %c0_18 = arith.constant 0 : index
      %24 = vector.load %arg8[%c0_17, %c0_18] : memref<16x128xf32, #tpu.memory_space<vmem>>, vector<16x128xf32>
      %c0_19 = arith.constant 0 : index
      %c0_20 = arith.constant 0 : index
      %25 = vector.load %arg6[%c0_19, %c0_20] : memref<1x128xf32, #tpu.memory_space<vmem>>, vector<1x128xf32>
      %26 = vector.broadcast %25 : vector<1x128xf32> to vector<16x128xf32>
      %27 = arith.addf %24, %26 : vector<16x128xf32>
      %c0_21 = arith.constant 0 : index
      %c0_22 = arith.constant 0 : index
      %28 = vector.load %arg7[%c0_21, %c0_22] : memref<16x128xf32, #tpu.memory_space<vmem>>, vector<16x128xf32>
      tpu.vector_store %arg7[%c0_21, %c0_22], %27 {strides = array<i32>} : memref<16x128xf32, #tpu.memory_space<vmem>>, vector<16x128xf32>,
    } else {
    }
    return
  }
  func.func @transform_0(%arg0: i32, %arg1: i32) -> (i32, i32) {
    %c0_i32 = arith.constant 0 : i32
    %c0_i32_0 = arith.constant 0 : i32
    return %arg0, %c0_i32 : i32, i32
  }
  func.func @transform_1(%arg0: i32, %arg1: i32) -> (i32, i32) {
    %c0_i32 = arith.constant 0 : i32
    %c0_i32_0 = arith.constant 0 : i32
    return %c0_i32, %arg1 : i32, i32
  }
  func.func @transform_2(%arg0: i32, %arg1: i32) -> (i32, i32) {
    %c0_i32 = arith.constant 0 : i32
    %c0_i32_0 = arith.constant 0 : i32
    return %c0_i32, %arg1 : i32, i32
  }
  func.func @transform_3(%arg0: i32, %arg1: i32) -> (i32, i32) {
    %c0_i32 = arith.constant 0 : i32
    %c0_i32_0 = arith.constant 0 : i32
    return %arg1, %c0_i32 : i32, i32
  }
  func.func @transform_4(%arg0: i32, %arg1: i32) -> (i32, i32) {
    %c0_i32 = arith.constant 0 : i32
    %c0_i32_0 = arith.constant 0 : i32
    %c0_i32_1 = arith.constant 0 : i32
    return %c0_i32, %c0_i32_0 : i32, i32
  }
  func.func @transform_5(%arg0: i32, %arg1: i32) -> (i32, i32) {
    %c0_i32 = arith.constant 0 : i32
    %c0_i32_0 = arith.constant 0 : i32
    return %arg0, %c0_i32 : i32, i32
  }
}

</mosaic_0001>

<bundles_post_ra>
// kernel: mlp_2_forward.1
= control target key start
LH: loop header
LB: loop body
LE: loop exit
PB: predicated region body
PF: predicated region fallthrough
CT: control target
= control target key end

     0   :  { %10 = vsyncpa [#allocation4], 0  ;;  %s449_s0 = inlined_call_operand.vmem [shape: f32[16,128], index: 0, kind: input, shape index: {}]   ;;  %s450_s1 = inlined_call_operand.hbm [shape: bf16[128,128], index: 1, kind: input, shape index: {}]   ;;  %s451_s2 = inlined_call_operand.vmem [shape: f32[1,128], index: 2, kind: input, shape index: {}]   ;;  %s452_s3 = inlined_call_operand.hbm [shape: bf16[128,128], index: 3, kind: input, shape index: {}]   ;;  %s453_s4 = inlined_call_operand.vmem [shape: f32[1,128], index: 4, kind: input, shape index: {}]   ;;  %s454_s5 = inlined_call_operand.vmem [shape: f32[16,128], index: 5, kind: output, shape index: {}]  }
   0x1   :  { %s18_s20 = sshll.u32 %s450_s1, 4  ;;  %s19_s20 = int_to_ptr.hbm [resolvable:$true] %s18_s20 }
   0x2   :  { %11 = vsyncpa [#allocation6], 0  ;;  %s391_s21 = smov [#allocation3]   ;;  %s33_s25 = sshll.u32 %s452_s3, 4  ;;  %s34_s25 = int_to_ptr.hbm [resolvable:$true] %s33_s25 }
   0x3   :  { %s20_s22 = sshll.u32 %s391_s21, 4  ;;  %s392_s26 = smov 64   ;;  %s21_s22 = int_to_ptr.vmem [resolvable:$true] %s20_s22 }
   0x4   :  { %s393_s27 = smov 4   ;;  %s394_s28 = smov [#allocation5]  }
   0x5   :  { %26 = dma.hbm_to_vmem [thread:$0]  %s19_s20, 1024, %s21_s22, [#allocation4], %s392_s26, %s392_s26, %s393_s27  }
   0x6   :  { %s35_s29 = sshll.u32 %s394_s28, 4  ;;  %s36_s29 = int_to_ptr.vmem [resolvable:$true] %s35_s29 }
   0x7   :  { %41 = dma.hbm_to_vmem [thread:$0]  %s34_s25, 1024, %s36_s29, [#allocation6], %s392_s26, %s392_s26, %s393_s27  }
   0x8   :  { %387 = dma.done.wait [#allocation4], 1024  }
   0x9   :  { %388 = vsyncadd [#allocation4], 4294966272 }
   0xa   :  { %389 = dma.done.wait [#allocation6], 1024  }
   0xb   :  { %390 = vsyncadd [#allocation6], 4294966272  ;;  %v324_v0 = vld [vmem:[#allocation3 + $0x38] sm:$0xff]  ;;  %v323_v1 = vld [vmem:[#allocation3 + $0x30] sm:$0xff] }
   0xc   :  { %129 = vmatpush.bf16.msra.mxu0 %v324_v0  ;;  %v332_v2 = vld [vmem:[#allocation5 + $0x38] sm:$0xff]  ;;  %v331_v3 = vld [vmem:[#allocation5 + $0x30] sm:$0xff]  ;;  %v322_v4 = vld [vmem:[#allocation3 + $0x28] sm:$0xff] }
   0xd   :  { %216 = vmatpush.bf16.msra.mxu1 %v332_v2  ;;  %v330_v5 = vld [vmem:[#allocation5 + $0x28] sm:$0xff]  ;;  %v321_v6 = vld [vmem:[#allocation3 + $0x20] sm:$0xff]  ;;  %v320_v8 = vld [vmem:[#allocation3 + $0x18] sm:$0xff] }
   0xe   :  { %v329_v7 = vld [vmem:[#allocation5 + $0x20] sm:$0xff]  ;;  %v319_v9 = vld [vmem:[#allocation3 + $0x10] sm:$0xff]  ;;  %v318_v10 = vld [vmem:[#allocation3 + $0x8] sm:$0xff] }
   0xf   :  { %v317_v11 = vld [vmem:[#allocation3] sm:$0xff]  ;;  %v59_v13 = vld [vmem:[%s449_s0 + $0x8] sm:$0xff]  ;;  %v328_v15 = vld [vmem:[#allocation5 + $0x18] sm:$0xff] }
  0x10   :  { %130 = vmatpush.bf16.msra.mxu0 %v323_v1  ;;  %v58_v12 = vld [vmem:[%s449_s0] sm:$0xff]  ;;  %v327_v16 = vld [vmem:[#allocation5 + $0x10] sm:$0xff]  ;;  %v326_v17 = vld [vmem:[#allocation5 + $0x8] sm:$0xff] }
  0x11   :  { %217 = vmatpush.bf16.msra.mxu1 %v331_v3  ;;  %v60_v14 = vpack.c.bf16 %v59_v13, %v58_v12  ;;  %v325_v18 = vld [vmem:[#allocation5] sm:$0xff] }
  0x12   :  { %v337_v20 = vld [vmem:[%s451_s2] ss:$0 sm:$0xff] }
  0x13   :  { %v338_v29 = vld [vmem:[%s453_s4] ss:$0 sm:$0xff] }
  0x14   :  { %131 = vmatpush.bf16.msra.mxu0 %v322_v4 }
  0x15   :  { %218 = vmatpush.bf16.msra.mxu1 %v330_v5 }
  0x18   :  { %132 = vmatpush.bf16.msra.mxu0 %v321_v6 }
  0x19   :  { %219 = vmatpush.bf16.msra.mxu1 %v329_v7 }
  0x1c   :  { %133 = vmatpush.bf16.msra.mxu0 %v320_v8 }
  0x1d   :  { %220 = vmatpush.bf16.msra.mxu1 %v328_v15 }
  0x20   :  { %134 = vmatpush.bf16.msra.mxu0 %v319_v9 }
  0x21   :  { %221 = vmatpush.bf16.msra.mxu1 %v327_v16 }
  0x24   :  { %135 = vmatpush.bf16.msra.mxu0 %v318_v10 }
  0x25   :  { %222 = vmatpush.bf16.msra.mxu1 %v326_v17 }
  0x28   :  { %136 = vmatpush.bf16.msra.mxu0 %v317_v11 }
  0x29   :  { %223 = vmatpush.bf16.msra.mxu1 %v325_v18 }
  0x2b   :  { %137 = vmatmul.bf16.vlgmr.msra.gmra.mxu0 %v60_v14 }
  0xa8   :  { %v138_v19 = vpop.f32.mrf.mxu0 }
  0xa9   :  { %v139_v21 = vadd.f32 %v337_v20, %v138_v19 }
  0xab   :  { %v145_v23 = vmul.f32 0.2, %v139_v21  ;;  %vm143_vm0 = vcmp.ge.f32.partialorder %v139_v21, 0.0 }
  0xad   :  { %v147_v26 = vsel %vm143_vm0, %v139_v21, %v145_v23 }
  0xb0   :  { %v140_v22 = vpop.f32.mrf.mxu0 }
  0xb1   :  { %v141_v24 = vadd.f32 %v337_v20, %v140_v22 }
  0xb3   :  { %v146_v25 = vmul.f32 0.2, %v141_v24  ;;  %vm144_vm1 = vcmp.ge.f32.partialorder %v141_v24, 0.0 }
  0xb5   :  { %v148_v27 = vsel %vm144_vm1, %v141_v24, %v146_v25 }
  0xb6   :  { %v151_v28 = vpack.c.bf16 %v148_v27, %v147_v26 }
  0xb8   :  { %224 = vmatmul.bf16.vlgmr.msra.gmra.mxu1 %v151_v28 }
 0x135   :  { %v225_v30 = vpop.f32.mrf.mxu1 }
 0x136   :  { %v243_v31 = vadd.f32 %v338_v29, %v225_v30 }
 0x138   :  { %245 = vst [vmem:[%s454_s5] sm:$0xff] %v243_v31 }
 0x13d   :  { %v227_v32 = vpop.f32.mrf.mxu1 }
 0x13e   :  { %v244_v33 = vadd.f32 %v338_v29, %v227_v32 }
 0x140   :  { %246 = vst [vmem:[%s454_s5 + $0x8] sm:$0xff] %v244_v33 }
 0x141   :  { %251 = vsyncpa [#allocation4], 1 }
 0x142   :  { %252 = vsyncpa [#allocation6], 1 }

// kernel: mlp_2_forward.1
= control target key start
LH: loop header
LB: loop body
LE: loop exit
PB: predicated region body
PF: predicated region fallthrough
CT: control target
= control target key end

     0   :  { %10 = vsyncpa [#allocation4], 0  ;;  %s449_s0 = inlined_call_operand.vmem [shape: f32[16,128], index: 0, kind: input, shape index: {}]   ;;  %s450_s1 = inlined_call_operand.hbm [shape: bf16[128,128], index: 1, kind: input, shape index: {}]   ;;  %s451_s2 = inlined_call_operand.vmem [shape: f32[1,128], index: 2, kind: input, shape index: {}]   ;;  %s452_s3 = inlined_call_operand.hbm [shape: bf16[128,128], index: 3, kind: input, shape index: {}]   ;;  %s453_s4 = inlined_call_operand.vmem [shape: f32[1,128], index: 4, kind: input, shape index: {}]   ;;  %s454_s5 = inlined_call_operand.vmem [shape: f32[16,128], index: 5, kind: output, shape index: {}]  }
   0x1   :  { %s18_s20 = sshll.u32 %s450_s1, 4  ;;  %s19_s20 = int_to_ptr.hbm [resolvable:$true] %s18_s20 }
   0x2   :  { %11 = vsyncpa [#allocation6], 0  ;;  %s391_s21 = smov [#allocation3]   ;;  %s33_s25 = sshll.u32 %s452_s3, 4  ;;  %s34_s25 = int_to_ptr.hbm [resolvable:$true] %s33_s25 }
   0x3   :  { %s20_s22 = sshll.u32 %s391_s21, 4  ;;  %s392_s26 = smov 64   ;;  %s21_s22 = int_to_ptr.vmem [resolvable:$true] %s20_s22 }
   0x4   :  { %s393_s27 = smov 4   ;;  %s394_s28 = smov [#allocation5]  }
   0x5   :  { %26 = dma.hbm_to_vmem [thread:$0]  %s19_s20, 1024, %s21_s22, [#allocation4], %s392_s26, %s392_s26, %s393_s27  }
   0x6   :  { %s35_s29 = sshll.u32 %s394_s28, 4  ;;  %s36_s29 = int_to_ptr.vmem [resolvable:$true] %s35_s29 }
   0x7   :  { %41 = dma.hbm_to_vmem [thread:$0]  %s34_s25, 1024, %s36_s29, [#allocation6], %s392_s26, %s392_s26, %s393_s27  }
   0x8   :  { %387 = dma.done.wait [#allocation4], 1024  }
   0x9   :  { %388 = vsyncadd [#allocation4], 4294966272 }
   0xa   :  { %389 = dma.done.wait [#allocation6], 1024  }
   0xb   :  { %390 = vsyncadd [#allocation6], 4294966272  ;;  %v324_v0 = vld [vmem:[#allocation3 + $0x38] sm:$0xff]  ;;  %v323_v1 = vld [vmem:[#allocation3 + $0x30] sm:$0xff] }
   0xc   :  { %129 = vmatpush.bf16.msra.mxu0 %v324_v0  ;;  %v332_v2 = vld [vmem:[#allocation5 + $0x38] sm:$0xff]  ;;  %v331_v3 = vld [vmem:[#allocation5 + $0x30] sm:$0xff]  ;;  %v322_v4 = vld [vmem:[#allocation3 + $0x28] sm:$0xff] }
   0xd   :  { %216 = vmatpush.bf16.msra.mxu1 %v332_v2  ;;  %v330_v5 = vld [vmem:[#allocation5 + $0x28] sm:$0xff]  ;;  %v321_v6 = vld [vmem:[#allocation3 + $0x20] sm:$0xff]  ;;  %v320_v8 = vld [vmem:[#allocation3 + $0x18] sm:$0xff] }
   0xe   :  { %v329_v7 = vld [vmem:[#allocation5 + $0x20] sm:$0xff]  ;;  %v319_v9 = vld [vmem:[#allocation3 + $0x10] sm:$0xff]  ;;  %v318_v10 = vld [vmem:[#allocation3 + $0x8] sm:$0xff] }
   0xf   :  { %v317_v11 = vld [vmem:[#allocation3] sm:$0xff]  ;;  %v59_v13 = vld [vmem:[%s449_s0 + $0x8] sm:$0xff]  ;;  %v328_v15 = vld [vmem:[#allocation5 + $0x18] sm:$0xff] }
  0x10   :  { %130 = vmatpush.bf16.msra.mxu0 %v323_v1  ;;  %v58_v12 = vld [vmem:[%s449_s0] sm:$0xff]  ;;  %v327_v16 = vld [vmem:[#allocation5 + $0x10] sm:$0xff]  ;;  %v326_v17 = vld [vmem:[#allocation5 + $0x8] sm:$0xff] }
  0x11   :  { %217 = vmatpush.bf16.msra.mxu1 %v331_v3  ;;  %v60_v14 = vpack.c.bf16 %v59_v13, %v58_v12  ;;  %v325_v18 = vld [vmem:[#allocation5] sm:$0xff] }
  0x12   :  { %v337_v20 = vld [vmem:[%s451_s2] ss:$0 sm:$0xff] }
  0x13   :  { %v338_v29 = vld [vmem:[%s453_s4] ss:$0 sm:$0xff] }
  0x14   :  { %131 = vmatpush.bf16.msra.mxu0 %v322_v4 }
  0x15   :  { %218 = vmatpush.bf16.msra.mxu1 %v330_v5 }
  0x18   :  { %132 = vmatpush.bf16.msra.mxu0 %v321_v6 }
  0x19   :  { %219 = vmatpush.bf16.msra.mxu1 %v329_v7 }
  0x1c   :  { %133 = vmatpush.bf16.msra.mxu0 %v320_v8 }
  0x1d   :  { %220 = vmatpush.bf16.msra.mxu1 %v328_v15 }
  0x20   :  { %134 = vmatpush.bf16.msra.mxu0 %v319_v9 }
  0x21   :  { %221 = vmatpush.bf16.msra.mxu1 %v327_v16 }
  0x24   :  { %135 = vmatpush.bf16.msra.mxu0 %v318_v10 }
  0x25   :  { %222 = vmatpush.bf16.msra.mxu1 %v326_v17 }
  0x28   :  { %136 = vmatpush.bf16.msra.mxu0 %v317_v11 }
  0x29   :  { %223 = vmatpush.bf16.msra.mxu1 %v325_v18 }
  0x2b   :  { %137 = vmatmul.bf16.vlgmr.msra.gmra.mxu0 %v60_v14 }
  0xa8   :  { %v138_v19 = vpop.f32.mrf.mxu0 }
  0xa9   :  { %v139_v21 = vadd.f32 %v337_v20, %v138_v19 }
  0xab   :  { %v145_v23 = vmul.f32 0.2, %v139_v21  ;;  %vm143_vm0 = vcmp.ge.f32.partialorder %v139_v21, 0.0 }
  0xad   :  { %v147_v26 = vsel %vm143_vm0, %v139_v21, %v145_v23 }
  0xb0   :  { %v140_v22 = vpop.f32.mrf.mxu0 }
  0xb1   :  { %v141_v24 = vadd.f32 %v337_v20, %v140_v22 }
  0xb3   :  { %v146_v25 = vmul.f32 0.2, %v141_v24  ;;  %vm144_vm1 = vcmp.ge.f32.partialorder %v141_v24, 0.0 }
  0xb5   :  { %v148_v27 = vsel %vm144_vm1, %v141_v24, %v146_v25 }
  0xb6   :  { %v151_v28 = vpack.c.bf16 %v148_v27, %v147_v26 }
  0xb8   :  { %224 = vmatmul.bf16.vlgmr.msra.gmra.mxu1 %v151_v28 }
 0x135   :  { %v225_v30 = vpop.f32.mrf.mxu1 }
 0x136   :  { %v243_v31 = vadd.f32 %v338_v29, %v225_v30 }
 0x138   :  { %245 = vst [vmem:[%s454_s5] sm:$0xff] %v243_v31 }
 0x13d   :  { %v227_v32 = vpop.f32.mrf.mxu1 }
 0x13e   :  { %v244_v33 = vadd.f32 %v338_v29, %v227_v32 }
 0x140   :  { %246 = vst [vmem:[%s454_s5 + $0x8] sm:$0xff] %v244_v33 }
 0x141   :  { %251 = vsyncpa [#allocation4], 1 }
 0x142   :  { %252 = vsyncpa [#allocation6], 1 }

</bundles_post_ra>
